<compile_context>
chip_gen: v7x
topology: tpu7x:2x2x1
jax: 0.10.0
libtpu: 0.0.40
codegen_flags: <defaults>
</compile_context>

<pallas_src>
import jax
import jax.numpy as jnp
from jax.experimental import pallas as pl
from jax.experimental.pallas import tpu as pltpu


# ---------------------------------------------------------------------------
# Kernel
# ---------------------------------------------------------------------------
def _gather_kernel(idx_ref, x_ref, o_ref):
    """Gather kept token rows via a one-hot selection matmul on the MXU.

    idx_ref: VMEM int32 [Bt, 1, Kout]  absolute source-row indices (CLS folded in)
    x_ref  : VMEM       [Bt, S, Dt]    current batch slab, all tokens (D chunk)
    o_ref  : VMEM       [Bt, Kout, Dt] kept tokens (CLS first when excluded from dropout)
    """
    s = x_ref.shape[1]
    kout = o_ref.shape[1]

    idx = idx_ref[:, 0, :]                                        # [Bt, Kout] int32
    # Shared iota, broadcast over the batch dim (cuts vreg pressure by ~Bt x).
    col = jax.lax.broadcasted_iota(jnp.int32, (1, kout, s), 2)    # [1, Kout, S]
    onehot = (col == idx[:, :, None]).astype(x_ref.dtype)         # [Bt, Kout, S], one 1/row

    if x_ref.dtype == jnp.float32:
        # HIGHEST precision keeps the f32 gather bit-exact (multi-pass f32 matmul).
        acc = jnp.einsum("bks,bsd->bkd", onehot, x_ref[...],
                         preferred_element_type=jnp.float32,
                         precision=jax.lax.Precision.HIGHEST)
    else:
        # Exactly one nonzero (== 1.0) per one-hot row -> exact in the output dtype;
        # skip the f32 accumulator + cast pass entirely.
        acc = jnp.einsum("bks,bsd->bkd", onehot, x_ref[...],
                         preferred_element_type=o_ref.dtype)
    o_ref[...] = acc.astype(o_ref.dtype)


# ---------------------------------------------------------------------------
# Tiling / grid planning
# ---------------------------------------------------------------------------
def _vmem_capacity_bytes():
    try:
        return int(pltpu.get_tpu_info().vmem_capacity_bytes)
    except Exception:
        return 64 << 20  # conservative (v7x-sized) fallback


def _dt_candidates(D):
    """D-chunk sizes: full D first, then divisors of D that are multiples of 128."""
    cands = [D]
    if D % 128 == 0:
        cands += [d for d in range(D - 128, 0, -128) if D % d == 0]
    return cands


def _plan(B, S, D, kout, isz, acc_isz, budget_bytes, x_bufs):
    """Pick (bt, gb, dt, gd): batch tile, batch steps, D tile, D steps."""
    fixed = kout * S * 4 + (2 << 20)  # shared iota + Mosaic internal scratch headroom

    def per_b(dt):
        return (2 * kout * 4            # index block, double-buffered
                + x_bufs * S * dt * isz  # x block, x_bufs-deep
                + 2 * kout * dt * isz    # out block, double-buffered
                + kout * S * isz         # one-hot intermediate
                + kout * dt * acc_isz)   # matmul accumulator

    # Largest D chunk whose bt=1 footprint fits the budget (falls back to full D).
    dt = D
    for cand in _dt_candidates(D):
        dt = cand
        if fixed + per_b(cand) <= budget_bytes:
            break

    bt_max = max(1, (budget_bytes - fixed) // per_b(dt))
    bt_max = min(bt_max, B)

    # Batch grid: at least 2 steps when B >= 2 (2-TC sharding + DMA/compute overlap);
    # prefer an even step count, but re-derive gb from bt so padded work stays minimal.
    gb = max(1, -(-B // bt_max))
    if B >= 2:
        gb = max(gb, 2)
    if gb > 1 and gb % 2 == 1 and gb < B:
        gb += 1
    gb = min(gb, B)
    bt = -(-B // gb)
    gb = -(-B // bt)

    gd = D // dt
    # Single-element batch: split D to still get >= 2 grid steps when it is splittable.
    if gb == 1 and gd == 1 and D % 256 == 0:
        dt = D // 2
        gd = 2

    return bt, gb, dt, gd


# ---------------------------------------------------------------------------
# Wrapper
# ---------------------------------------------------------------------------
def patch_dropout_gather(x, keep_indices, exclude_first_token=True):
    """x: [B, S, D]; keep_indices: [B, K] int32 -> [B, K + offset, D]."""
    B, S, D = x.shape
    K = keep_indices.shape[1]
    offset = 1 if exclude_first_token else 0
    kout = K + offset

    keep_indices = keep_indices.astype(jnp.int32)
    if exclude_first_token:
        # CLS (row 0) always kept at output position 0; kept patch rows shift by +1.
        full_idx = jnp.concatenate(
            [jnp.zeros((B, 1), jnp.int32), keep_indices + 1], axis=1)
    else:
        full_idx = keep_indices

    # Pad Kout to a multiple of 8 (sublane) with index 0; extra rows sliced off below.
    kout_pad = -(-kout // 8) * 8
    if kout_pad != kout:
        full_idx = jnp.pad(full_idx, ((0, 0), (0, kout_pad - kout)))
    # Shape [B, 1, Kout] so the per-step block equals the array's last-two dims.
    full_idx = full_idx[:, None, :]

    isz = x.dtype.itemsize
    acc_isz = 2 if x.dtype == jnp.bfloat16 else 4

    vmem_cap = _vmem_capacity_bytes()
    large_vmem = vmem_cap >= (100 << 20)            # v5e / v6e (128 MiB parts)
    budget = (72 << 20) if large_vmem else (36 << 20)
    vmem_limit = (100 << 20) if large_vmem else max(
        32 << 20, min(vmem_cap - (8 << 20), 48 << 20))

    # Plan with default double-buffering; enable deeper prefetch of x only on
    # 128 MiB-VMEM parts when there are enough steps to benefit (never on v7x).
    bt, gb, dt, gd = _plan(B, S, D, kout_pad, isz, acc_isz, budget, x_bufs=2)
    x_bufs = 3 if (large_vmem and gb * gd >= 3) else 2
    if x_bufs == 3:
        bt, gb, dt, gd = _plan(B, S, D, kout_pad, isz, acc_isz, budget, x_bufs=3)

    # Pad batch instead of collapsing bt toward 1 for awkward B.
    B_pad = bt * gb
    if B_pad != B:
        x = jnp.pad(x, ((0, B_pad - B), (0, 0), (0, 0)))
        full_idx = jnp.pad(full_idx, ((0, B_pad - B), (0, 0), (0, 0)))

    if x_bufs == 3:
        x_spec = pl.BlockSpec((bt, S, dt), lambda b, d: (b, 0, d),
                              pipeline_mode=pl.Buffered(3))
    else:
        x_spec = pl.BlockSpec((bt, S, dt), lambda b, d: (b, 0, d))

    out = pl.pallas_call(
        _gather_kernel,
        out_shape=jax.ShapeDtypeStruct((B_pad, kout_pad, D), x.dtype),
        grid_spec=pltpu.PrefetchScalarGridSpec(
            num_scalar_prefetch=0,
            grid=(gb, gd),
            in_specs=[
                pl.BlockSpec((bt, 1, kout_pad), lambda b, d: (b, 0, 0)),  # indices
                x_spec,                                                   # activations
            ],
            out_specs=pl.BlockSpec((bt, kout_pad, dt), lambda b, d: (b, 0, d)),
        ),
        compiler_params=pltpu.CompilerParams(
            dimension_semantics=("parallel", "parallel"),  # batch / D-chunk independent
            vmem_limit_bytes=int(vmem_limit),
        ),
    )(full_idx, x)

    if B_pad != B or kout_pad != kout:
        out = out[:B, :kout]
    return out


class PatchDropout:
    """JAX/Pallas port of the PyTorch PatchDropout module (forward pass)."""

    def __init__(self, prob, exclude_first_token=True):
        assert 0 <= prob < 1.0
        self.prob = prob
        self.exclude_first_token = exclude_first_token

    def __call__(self, x, key, training=True):
        if (not training) or self.prob == 0.0:
            return x

        B, S, D = x.shape
        num_tokens = S - 1 if self.exclude_first_token else S
        keep_prob = 1.0 - self.prob
        num_keep = max(1, int(num_tokens * keep_prob))

        # torch.randn(batch, num_tokens).topk(...).indices -> random keep subset.
        # TODO(synk): RNG/top-k kept in plain JAX glue (tiny, no Pallas benefit).
        rand = jax.random.normal(key, (B, num_tokens), dtype=jnp.float32)
        _, keep_idx = jax.lax.top_k(rand, num_keep)

        return patch_dropout_gather(x, keep_idx, self.exclude_first_token)


# ---------------------------------------------------------------------------
# Reference + smoke test
# ---------------------------------------------------------------------------
def _reference_gather(x, keep_idx, exclude_first_token):
    """Pure-jnp reference of x[batch_indices, patch_indices_keep] (+ CLS concat)."""
    if exclude_first_token:
        cls_tok, body = x[:, :1], x[:, 1:]
    else:
        cls_tok, body = None, x
    gathered = jnp.take_along_axis(body, keep_idx[..., None], axis=1)
    if exclude_first_token:
        gathered = jnp.concatenate([cls_tok, gathered], axis=1)
    return gathered


if __name__ == "__main__":
    key = jax.random.PRNGKey(0)
    k_x, k_drop = jax.random.split(key)

    B, S, D = 2, 9, 32           # 1 CLS token + 8 patch tokens, hidden 32
    prob = 0.5
    x = jax.random.normal(k_x, (B, S, D), dtype=jnp.float32)

    module = PatchDropout(prob=prob, exclude_first_token=True)

    # --- run the Pallas kernel ---
    out = jax.block_until_ready(module(x, k_drop, training=True))

    # --- cross-check against a pure-JAX reference using the same indices ---
    num_tokens = S - 1
    num_keep = max(1, int(num_tokens * (1.0 - prob)))
    rand = jax.random.normal(k_drop, (B, num_tokens), dtype=jnp.float32)
    _, keep_idx = jax.lax.top_k(rand, num_keep)
    ref = _reference_gather(x, keep_idx.astype(jnp.int32), True)

    assert out.shape == (B, 1 + num_keep, D), out.shape
    assert out.dtype == x.dtype
    assert jnp.allclose(out, ref, atol=1e-5, rtol=1e-5), "Pallas gather mismatch vs reference"

    # eval mode / prob==0 pass-through semantics
    assert jnp.allclose(module(x, k_drop, training=False), x)

    print("KERNEL_OK")
</pallas_src>

<mosaic_0001>
module attributes {stable_mosaic.version = 11 : i64} {
  func.func @_gather_kernel(%arg0: i32, %arg1: i32, %arg2: memref<1x1x8xi32, #tpu.memory_space<vmem>>, %arg3: memref<1x9x32xf32, #tpu.memory_space<vmem>>, %arg4: memref<1x8x32xf32, #tpu.memory_space<vmem>>) attributes {dimension_semantics = [#tpu.dimension_semantics<parallel>, #tpu.dimension_semantics<parallel>], iteration_bounds = array<i64: 2, 1>, scalar_prefetch = 0 : i64, scratch_operands = 0 : i64, tpu.core_type = #tpu.core_type<tc>, window_params = [{transform_indices = @transform_0, window_bounds = array<i64: 1, 1, 8>}, {transform_indices = @transform_1, window_bounds = array<i64: 1, 9, 32>}, {transform_indices = @transform_2, window_bounds = array<i64: 1, 8, 32>}]} {
    %c0 = arith.constant 0 : index
    %c0_0 = arith.constant 0 : index
    %c0_1 = arith.constant 0 : index
    %0 = vector.load %arg2[%c0, %c0_0, %c0_1] : memref<1x1x8xi32, #tpu.memory_space<vmem>>, vector<1x1x8xi32>
    %1 = vector.shape_cast %0 : vector<1x1x8xi32> to vector<1x8xi32>
    %2 = tpu.iota {dimensions = array<i32: 2>} : vector<1x8x9xi32>
    %3 = vector.shape_cast %1 : vector<1x8xi32> to vector<1x8x1xi32>
    %4 = vector.broadcast %3 : vector<1x8x1xi32> to vector<1x8x9xi32>
    %5 = arith.cmpi eq, %2, %4 : vector<1x8x9xi32>
    %6 = arith.extui %5 : vector<1x8x9xi1> to vector<1x8x9xi32>
    %7 = arith.sitofp %6 : vector<1x8x9xi32> to vector<1x8x9xf32>
    %c0_2 = arith.constant 0 : index
    %c0_3 = arith.constant 0 : index
    %c0_4 = arith.constant 0 : index
    %8 = vector.load %arg3[%c0_2, %c0_3, %c0_4] : memref<1x9x32xf32, #tpu.memory_space<vmem>>, vector<1x9x32xf32>
    "tpu.trace_start"() <{level = 10 : i32, message = "bks,bsd->bkd"}> : () -> ()
    %cst = arith.constant dense<0.000000e+00> : vector<1x8x32xf32>
    %9 = tpu.matmul %7, %8, %cst {dimension_numbers = #tpu.dot_dimension_numbers<[2], [1], [1], [2], [0, 0, 0, 1, 1, 2], [0], [0]>, precision = #tpu.contract_precision<fp32>} : vector<1x8x9xf32>, vector<1x9x32xf32>, vector<1x8x32xf32> -> vector<1x8x32xf32>
    "tpu.trace_stop"() : () -> ()
    %c0_5 = arith.constant 0 : index
    %c0_6 = arith.constant 0 : index
    %c0_7 = arith.constant 0 : index
    %10 = vector.load %arg4[%c0_5, %c0_6, %c0_7] : memref<1x8x32xf32, #tpu.memory_space<vmem>>, vector<1x8x32xf32>
    tpu.vector_store %arg4[%c0_5, %c0_6, %c0_7], %9 {strides = array<i32>} : memref<1x8x32xf32, #tpu.memory_space<vmem>>, vector<1x8x32xf32>,
    return
  }
  func.func @transform_0(%arg0: i32, %arg1: i32) -> (i32, i32, i32) {
    %c0_i32 = arith.constant 0 : i32
    %c0_i32_0 = arith.constant 0 : i32
    %c0_i32_1 = arith.constant 0 : i32
    return %arg0, %c0_i32, %c0_i32_0 : i32, i32, i32
  }
  func.func @transform_1(%arg0: i32, %arg1: i32) -> (i32, i32, i32) {
    %c0_i32 = arith.constant 0 : i32
    %c0_i32_0 = arith.constant 0 : i32
    return %arg0, %c0_i32, %arg1 : i32, i32, i32
  }
  func.func @transform_2(%arg0: i32, %arg1: i32) -> (i32, i32, i32) {
    %c0_i32 = arith.constant 0 : i32
    %c0_i32_0 = arith.constant 0 : i32
    return %arg0, %c0_i32, %arg1 : i32, i32, i32
  }
}

</mosaic_0001>

<bundles_post_ra>
// kernel: tpu_custom_call.1
= control target key start
LH: loop header
LB: loop body
LE: loop exit
PB: predicated region body
PF: predicated region fallthrough
CT: control target
= control target key end

     0   :  { %7 = vsyncpa [#allocation3], 0  ;;  %s1150_s0 = inlined_call_operand.vmem [shape: s32[2,1,8], index: 0, kind: input, shape index: {}]   ;;  %s1151_s1 = inlined_call_operand.vmem [shape: f32[2,9,32], index: 1, kind: input, shape index: {}]   ;;  %s1152_s2 = inlined_call_operand.hbm [shape: f32[2,8,32], index: 2, kind: output, shape index: {}]  }
   0x1   :  { %9 = vsyncpa [#allocation3 + $0x1], 0  ;;  %s1025_s9 = smov 0   ;;  %s1027_s10 = smov 0  }
   0x2   :  { %s1029_s11 = smov 0   ;;  %s1031_s12 = smov 0  }
   0x3   :  { %s1033_s13 = smov 0   ;;  %s1035_s14 = smov 0  }
   0x4 LB: > { %s763_s15 = sadd.s32 4294967295, %s1004_s14   ;;  %s764_s16 = sadd.s32 4294967294, %s1004_s14   ;;  %s1004_s14 = sphi %s1035_s14, %s15_s14   ;;  %s1000_s13 = sphi %s1033_s13, %s1159_s13   ;;  %s996_s12 = sphi %s1031_s12, %s1158_s12   ;;  %s992_s11 = sphi %s1029_s11, %s1157_s11   ;;  %s988_s10 = sphi %s1027_s10, %s1156_s10   ;;  %s984_s9 = sphi %s1025_s9, %s1155_s9  }
   0x5   : > { %s27_s17 = sadd.s32 1, %s1000_s13  ;;  %s90_s18 = sadd.s32 1, %s992_s11 }
   0x6   : > { %p29_p0 = scmp.ge.s32.totalorder %s27_s17, 2  ;;  %p100_p1 = scmp.ne.s32.totalorder %s992_s11, %s988_s10 }
   0x7   : > { %p101_p2 = scmp.eq.s32.totalorder %s763_s15, 1  ;;  %p106_p3 = scmp.ne.s32.totalorder %s988_s10, %s984_s9 }
   0x8   : > { %s1161_s17 = smov (%p29_p0, %s27_s17), 0  ;;  %p107_p5 = scmp.eq.s32.totalorder %s764_s16, 1 }
   0x9   : > { %p1065_p4 = por %p101_p2, %p100_p1  ;;  %s85_s20 = ssub.s32 %s1000_s13, %s1161_s17 }
   0xa   : > { %p767_p6 = scmp.ge.s32.totalorder %s1004_s14, 1  ;;  %p88_p7 = scmp.eq.s32.totalorder %s85_s20, 0 }
   0xb   : > { %p1072_p8 = por %p107_p5, %p106_p3  ;;  %p142_p9 = scmp.lt.s32.totalorder %s1004_s14, 3 }
   0xc   : > { %s1078_s22 = scalar_select %p88_p7, %s992_s11, %s90_s18  }
   0xd   : > { %p143_p10 = pnand %p767_p6, %p142_p9 }
   0xe   : > { %p170_p11 = scmp.lt.s32.totalorder (!%p143_p10), %s996_s12, 1  ;;  %v1006_v0 = vmov (!%p143_p10), 0.0|0.0   ;;  %vm1007_vm0 = vmmov (!%p143_p10), 0   ;;  %v1008_v1 = vmov (!%p143_p10), 0.0   ;;  %vm200_vm1 = vcmask (!%p143_p10), 1040384   ;;  %s167_s3 = sand.u32 (!%p143_p10), 1, %s988_s10  }
   0xf   : > { %146 = sbr.rel (%p143_p10) target bundleno = 396 (0x18c), region = 28  ;;  %850 = vmatprep.subr.bf16.mxu0 (!%p143_p10), %v1006_v0  ;;  %841 = vmatprep.subr.bf16.mxu1 (!%p143_p10), %v1006_v0  ;;  %v182_v20 = vlaneseq (!%p143_p10)  ;;  %vm196_vm2 = vcmask (!%p143_p10), 72704   ;;  %s768_s4 = sshll.u32 (!%p143_p10), %s167_s3, 3  ;;  %vm663_vm4 = vcmask (!%p143_p10), 261120  }
  0x10   : > { %824 = vmatprep.mubr.msk.f32.mxu0 (!%p143_p10), %vm1007_vm0, %v1008_v1  ;;  %803 = vmatprep.mubr.msk.f32.mxu1 (!%p143_p10), %vm1007_vm0, %v1008_v1  ;;  %s777_s5 = sshll.u32 (!%p143_p10), %s996_s12, 7  ;;  %s169_s6 = scalar_lea.vmem (!%p143_p10), [#allocation2], %s768_s4 }
  0x11   : > { %v183_v21 = vand.u32 (!%p143_p10), 127, %v182_v20  ;;  %s680_s7 = sshll.u32 (!%p143_p10), %s169_s6, 4  ;;  %s1103_s16 = scalar_lea.hbm (!%p143_p10), %s1152_s2, %s777_s5  ;;  %s1105_s7 = int_to_ptr.vmem [resolvable:$true] %s680_s7 }
  0x12   : > { %s666_s18 = scalar_lea.sflag (!%p143_p10), [#allocation3], %s167_s3  ;;  %s926_s20 = scalar_lea.vmem (!%p143_p10), %s1105_s7, 128 }
  0x13   : > { %p927_p12 = scmp.ne.s32.totalorder (!%p143_p10), %s1105_s7, %s926_s20 }
  0x15   : > { %p928_p13 = pnand (!%p143_p10), %p927_p12, %p1065_p4 }
  0x16   : > { %s171_s23 = scalar_select %p170_p11, %s996_s12, 1 }
  0x17   : > { %p929_p0 = pneg %p928_p13  ;;  %s1009_s12 = smov [#allocation2]  }
  0x18   : > { %s172_s26 = scalar_lea.vmem %s1150_s0, %s171_s23  ;;  %s780_s27 = sshll.u32 %s171_s23, 4 }
  0x19   : > { %s180_s30 = scalar_lea.vmem %s1151_s1, %s780_s27  ;;  %v771_v2 = vld [vmem:[%s172_s26] ss:$0 sm:$0xff]  ;;  %s930_s23 = sshll.u32 %s1009_s12, 4  ;;  %s931_s23 = int_to_ptr.vmem [resolvable:$false] %s930_s23 }
  0x1a   : > { %189 = vbcast.lane.b32.xlu0 %v771_v2, 256  ;;  %v194_v3 = vld [vmem:[%s180_s30] sm:$0xff]  ;;  %v195_v4 = vld [vmem:[%s180_s30 + $0x8] sm:$0x1]  ;;  %s932_s24 = scalar_lea.vmem %s931_s23, 256  ;;  %p933_p1 = scmp.lt.s32.totalorder %s1105_s7, %s931_s23 }
  0x1b   : > { %v202_v5 = vsel %vm200_vm1, %v195_v4, 0  ;;  %v205_v6 = vand.u32 4294901760, %v194_v3  ;;  %p934_p2 = scmp.lt.s32.totalorder %s932_s24, %s926_s20 }
  0x1c   : > { %v208_v7 = vand.u32 4294901760, %v202_v5 }
  0x1d   : > { %v283_v8 = vsub.f32 %v194_v3, %v205_v6  ;;  %p935_p3 = por %p934_p2, %p933_p1 }
  0x1e   : > { %v842_v9 = vpack.c.bf16 %v208_v7, %v205_v6  ;;  %v290_v10 = vsub.f32 %v202_v5, %v208_v7 }
  0x1f   : > { %v284_v11 = vand.u32 4294901760, %v283_v8  ;;  %p936_p5 = pnand %p935_p3, %p929_p0 }
  0x20   : > { %852 = vmatpush3.bf16.msra.mxu0 %v842_v9  ;;  %843 = vmatpush3.bf16.msra.mxu1 %v842_v9  ;;  %v291_v12 = vand.u32 4294901760, %v290_v10  ;;  %v848_v13 = vpack.c.bf16 %v290_v10, %v283_v8 }
  0x21   : > { %844 = vmatprep.subr.bf16.mxu1 %v1006_v0  ;;  %853 = vmatprep.subr.bf16.mxu0 %v1006_v0  ;;  %v285_v14 = vsub.f32 %v283_v8, %v284_v11 }
  0x22   : > { %v292_v15 = vsub.f32 %v290_v10, %v291_v12  ;;  %v854_v16 = vpack.c.bf16 %v291_v12, %v284_v11 }
  0x23   : > { %v286_v17 = vand.u32 4294901760, %v285_v14 }
  0x24   : > { %v293_v18 = vand.u32 4294901760, %v292_v15 }
  0x26   : > { %v845_v19 = vpack.c.bf16 %v293_v18, %v286_v17 }
  0x8c   : > { %v190_v22 = vpop.permute.xlu0 %189 }
  0x8d   : > { %vm191_vm3 = vcmp.eq.s32.totalorder %v183_v21, %v190_v22 }
  0x8e   : > { %v772_v23 = vsel %vm191_vm3, 1.0, %v1008_v1 }
  0x8f   : > { %v198_v24 = vsel %vm196_vm2, %v772_v23, 0 }
  0x90   : > { %v272_v25 = vsub.f32 %v198_v24, %v198_v24 }
  0x92   : > { %v273_v26 = vand.u32 4294901760, %v272_v25 }
  0x94   : > { %825 = vmatmul.mubr.f32.vlgmr.msra.gmra.mrb[0].mxu0 %v273_v26  ;;  %v274_v27 = vsub.f32 %v272_v25, %v273_v26 }
  0x95   : > { %855 = vmatpush3.bf16.msra.mxu0 %v854_v16  ;;  %831 = vmatprep.mubr.msk.f32.mxu0 %vm1007_vm0, %v1008_v1 }
  0x96   : > { %v275_v28 = vand.u32 4294901760, %v274_v27  ;;  %856 = vmatprep.subr.bf16.mxu0 %v1006_v0 }
  0x98   : > { %804 = vmatmul.mubr.f32.vlgmr.msra.gmra.mrb[0].mxu1 %v275_v28 }
  0x99   : > { %846 = vmatpush3.bf16.msra.mxu1 %v845_v19  ;;  %810 = vmatprep.mubr.msk.f32.mxu1 %vm1007_vm0, %v1008_v1 }
  0x9a   : > { %847 = vmatprep.subr.bf16.mxu1 %v1006_v0 }
  0x9c   : > { %832 = vmatmul.mubr.msk.f32.vlgmr.msra.gmra.mrb[0].mxu0 %vm196_vm2, %v772_v23 }
  0x9d   : > { %858 = vmatpush3.bf16.msra.mxu0 %v842_v9  ;;  %838 = vmatprep.mubr.msk.f32.mxu0 %vm1007_vm0, %v1008_v1 }
  0xa0   : > { %811 = vmatmul.mubr.msk.f32.vlgmr.msra.gmra.mrb[0].mxu1 %vm196_vm2, %v772_v23 }
  0xa1   : > { %849 = vmatpush3.bf16.msra.mxu1 %v848_v13  ;;  %817 = vmatprep.mubr.msk.f32.mxu1 %vm1007_vm0, %v1008_v1 }
  0xa4   : > { %839 = vmatmul.mubr.msk.f32.vlgmr.msra.gmra.mrb[0].mxu0 %vm196_vm2, %v772_v23 }
  0xa8   : > { %818 = vmatmul.mubr.f32.vlgmr.msra.gmra.mrb[0].mxu1 %v272_v25 }
 0x177   : > { %v659_v29 = vpop.f32.mrb[0].mxu0 }
 0x178   : > { %v840_v30 = vpop.f32.mrb[1].mxu0 }
 0x17b   : > { %v434_v31 = vpop.f32.mrb[0].mxu1 }
 0x17c   : > { %v859_v32 = vadd.f32 %v659_v29, %v434_v31  ;;  %v819_v33 = vpop.f32.mrb[1].mxu1 }
 0x17e   : > { %664 = vst.msk [vmem:[%s169_s6] sm:$0xff] %vm663_vm4, %v859_v32 }
 0x17f   : > { %939 = shalt.err (!%p936_p5)
}
 0x180   : > { %s940_s25 = scalar_lea.hbm %s1103_s16, 128  ;;  %s944_s28 = scalar_lea.hbm %s1152_s2, 256 }
 0x181   : > { %p941_p6 = scmp.ne.s32.totalorder %s1103_s16, %s940_s25  ;;  %p945_p10 = scmp.lt.u32.totalorder %s1103_s16, %s1152_s2 }
 0x182   : > { %p946_p11 = scmp.lt.u32.totalorder %s944_s28, %s940_s25  ;;  %p948_p13 = scmp.lt.u32.totalorder %s940_s25, %s1103_s16 }
 0x183   : > { %p942_p7 = pnand %p941_p6, %p1065_p4 }
 0x184   : > { %p947_p12 = por %p946_p11, %p945_p10 }
 0x185   : > { %p943_p9 = pneg %p942_p7 }
 0x186   : > { %p949_p0 = por %p948_p13, %p947_p12 }
 0x188   : > { %p950_p1 = pnand %p949_p0, %p943_p9 }
 0x18a   : > { %953 = shalt.err (!%p950_p1)
}
 0x18b   : > { %868 = dma.vmem_to_hbm [thread:$0]  (%p1065_p4), %s1105_s7, 128, %s1103_s16, %s666_s18  }
 0x18c PF: > { %p874_p2 = scmp.ge.s32.totalorder %s1004_s14, 2  ;;  %s692_s3 = sand.u32 1, %s984_s9  }
 0x18d   : > { %s693_s4 = scalar_lea.sflag [#allocation3], %s692_s3 }
 0x18e   : > { %p871_p3 = pnand %p874_p2, %p1072_p8 }
 0x190   : > { %979 = dma.done.wait (!%p871_p3), %s693_s4, 128  }
 0x191   : > { %981 = vsyncadd (!%p871_p3), %s693_s4, 4294967168  ;;  %s15_s14 = sadd.s32 1, %s1004_s14   ;;  %s1155_s9 = smov %s988_s10 }
 0x192   : > { %p12_p5 = scmp.ge.s32.totalorder %s15_s14, 4   ;;  %s1156_s10 = smov %s992_s11 }
 0x193   : > { %s1157_s11 = smov %s1078_s22  ;;  %s1158_s12 = smov %s1000_s13 }
 0x194   : > { %s1159_s13 = smov %s1161_s17  ;;  %14 = sbr.rel (!%p12_p5) target bundleno = 4 (0x4), region = 66 }
 0x19b   :  { %698 = vsyncpa [#allocation3], 1 }
 0x19c   :  { %700 = vsyncpa [#allocation3 + $0x1], 1 }

</bundles_post_ra>
